<compile_context>
chip_gen: v7x
topology: tpu7x:2x2x1
jax: 0.10.0
libtpu: 0.0.40
codegen_flags: <defaults>
</compile_context>

<pallas_src>
import functools

import jax
import jax.numpy as jnp
from jax import lax
from jax.experimental import pallas as pl
from jax.experimental.pallas import tpu as pltpu


# ----------------------------- Pallas kernel --------------------------------

def _s4_kernel(t_tile, t_idx_ref, s_idx_ref, u_ref, k_ref, d_ref, o_ref, acc_ref):
    # t_idx_ref / s_idx_ref: SMEM tables of causal (t, s) block pairs.
    p = pl.program_id(2)
    t_b = t_idx_ref[p]
    s_b = s_idx_ref[p]
    off = t_b - s_b                     # block-diagonal offset (>= 0, causal only)
    n_groups = t_tile // 8

    @pl.when(s_b == 0)                  # first pair of this t-group
    def _():
        acc_ref[...] = jnp.zeros_like(acc_ref)

    def group_body(g, acc):
        # One aligned (multiple-of-8) K start row shared by all 8 phases.
        s0 = pl.multiple_of((off + 1) * t_tile - 8 * g, 8)
        for j in range(8):              # static unroll over the 8 sublane phases
            si = 8 * g + j              # local source row inside the s tile
            u_row = u_ref[pl.ds(si, 1), :]          # (1, Dblk), sublane-broadcast in MAC
            k_win = k_ref[j, pl.ds(s0, t_tile), :]  # (T, Dblk), sublane-aligned slice
            acc = acc + k_win * u_row               # VPU MAC, f32 accumulate
        return acc

    acc = lax.fori_loop(0, n_groups, group_body, acc_ref[...],
                        unroll=min(n_groups, 2))

    @pl.when(s_b != t_b)                # more pairs of this group follow
    def _():
        acc_ref[...] = acc

    @pl.when(s_b == t_b)                # diagonal pair: fold D*u skip, write out
    def _():
        o_ref[...] = (acc + d_ref[...] * u_ref[...]).astype(o_ref.dtype)


def s4_forward(u, K_dl, d_skip, *, t_tile=128, d_block=128):
    """u: (B, L, D); K_dl: (D, L); d_skip: (1, 1, D).  Returns (B, L, D)."""
    batch, l_max, d_model = u.shape
    assert t_tile % 8 == 0 and d_block % 128 == 0

    l_pad = ((l_max + t_tile - 1) // t_tile) * t_tile
    d_pad = ((d_model + d_block - 1) // d_block) * d_block
    n_blk = l_pad // t_tile
    n_dblk = d_pad // d_block
    n_pairs = n_blk * (n_blk + 1) // 2

    # Causal (t, s) pair tables, grouped by t with s ascending (reduction order).
    t_list = [t for t in range(n_blk) for _ in range(t + 1)]
    s_list = [s for t in range(n_blk) for s in range(t + 1)]
    t_idx = jnp.asarray(t_list, jnp.int32)
    s_idx = jnp.asarray(s_list, jnp.int32)

    f32 = jnp.float32
    # Lane-dense padding (layout plumbing done in XLA, not inside the kernel).
    u_pad = jnp.pad(u.astype(f32),
                    ((0, 0), (0, l_pad - l_max), (0, d_pad - d_model)))
    # Lag-major K with t_tile zero rows prepended (negative lags read zeros) and
    # zero rows appended up to l_pad:  k_base[T + lag, d] = K[d, lag].
    k_base = jnp.pad(jnp.transpose(K_dl).astype(f32),
                     ((t_tile, l_pad - l_max), (0, d_pad - d_model)))
    # 8 sublane-phase copies: k_phases[j, m, :] = k_base[m - j, :]  (zeros above).
    # This keeps every in-kernel K slice start sublane-aligned.
    k_phases = jnp.stack(
        [jnp.pad(k_base, ((j, 0), (0, 0)))[: k_base.shape[0]] for j in range(8)],
        axis=0)                                           # (8, l_pad + T, d_pad)
    d_vec = jnp.pad(d_skip.reshape(1, d_model).astype(f32),
                    ((0, 0), (0, d_pad - d_model)))       # (1, d_pad)

    kernel = functools.partial(_s4_kernel, t_tile)

    # Advisory cost estimate (flops ~ B * L^2 * D).
    flops = 2.0 * batch * n_dblk * n_pairs * t_tile * t_tile * d_block
    bytes_accessed = (4.0 * batch * n_dblk * n_pairs * t_tile * d_block   # streamed u
                      + 4.0 * batch * l_pad * d_pad                       # output
                      + 4.0 * 8 * (l_pad + t_tile) * d_pad)               # resident K
    cost = pl.CostEstimate(flops=int(flops), transcendentals=0,
                           bytes_accessed=int(bytes_accessed))

    # VMEM budget: resident K slab (+ double buffer) + pipelined u/out tiles.
    k_bytes = 8 * (l_pad + t_tile) * d_block * 4
    tile_bytes = t_tile * d_block * 4
    vmem_est = 2 * k_bytes + 8 * tile_bytes + (2 << 20)
    vmem_limit = int(min(max(vmem_est, 32 * 1024 * 1024), 64 * 1024 * 1024))

    out = pl.pallas_call(
        kernel,
        out_shape=jax.ShapeDtypeStruct((batch, l_pad, d_pad), u.dtype),
        grid_spec=pltpu.PrefetchScalarGridSpec(
            num_scalar_prefetch=2,
            grid=(batch, n_dblk, n_pairs),
            in_specs=[
                # streamed u source tile of the current (t, s) pair (s-indexed);
                # on the diagonal pair these are also the query rows for D*u.
                pl.BlockSpec((None, t_tile, d_block),
                             lambda b, d, p, ti, si: (b, si[p], d)),
                # resident 8-phase K slab (grid-invariant in b / pair axis).
                pl.BlockSpec((8, l_pad + t_tile, d_block),
                             lambda b, d, p, ti, si: (0, 0, d)),
                # skip-connection parameter.
                pl.BlockSpec((1, d_block),
                             lambda b, d, p, ti, si: (0, d)),
            ],
            out_specs=pl.BlockSpec((None, t_tile, d_block),
                                   lambda b, d, p, ti, si: (b, ti[p], d)),
            scratch_shapes=[pltpu.VMEM((t_tile, d_block), jnp.float32)],
        ),
        compiler_params=pltpu.CompilerParams(
            dimension_semantics=("parallel", "parallel", "arbitrary"),
            vmem_limit_bytes=vmem_limit),
        cost_estimate=cost,
    )(t_idx, s_idx, u_pad, k_phases, d_vec)

    return out[:, :l_max, :d_model]


# ----------------------- parameter / K setup (plain JAX) --------------------

def make_params(key, d_model, n):
    kb, kc, ks = jax.random.split(key, 3)
    std = (2.0 / (n + d_model)) ** 0.5          # xavier_normal_, gain=1
    B = jax.random.normal(kb, (n, d_model), jnp.float32) * std
    C = jax.random.normal(kc, (d_model, n), jnp.float32) * std
    D = jnp.ones((1, 1, d_model), jnp.float32)
    dt_min, dt_max = 1e-3, 1e-1                 # _log_step_initializer + exp
    log_step = (jax.random.uniform(ks, (d_model,), jnp.float32)
                * (jnp.log(dt_max) - jnp.log(dt_min)) + jnp.log(dt_min))
    step = jnp.exp(log_step)
    return B, C, D, step


def compute_K(B, C, step, n, l_max):
    # A = diag(2, 3, ..., n+1)  (from _make_diagonal); bilinear discretization.
    a = jnp.arange(2, n + 2, dtype=jnp.float32)                 # (n,)
    denom = 1.0 - 0.5 * step[None, :] * a[:, None]              # (n, D)
    Ab = (1.0 + 0.5 * step[None, :] * a[:, None]) / denom       # diag of Abar
    Bb = (step[None, :] / denom) * B                            # (n, D)
    powers = Ab[None, :, :] ** jnp.arange(
        l_max, dtype=jnp.float32)[:, None, None]                # (L, n, D)
    # K[d, l] = sum_j C[d, j] * Ab[j, d]^l * Bb[j, d]
    return jnp.einsum("dj,ljd,jd->dl", C, powers, Bb)           # (D, L)


# --------------------------- pure-JAX reference ------------------------------
# Direct causal convolution; mathematically identical to the module's
# FFT-based _non_circular_convolution (the FFT is only an algorithmic choice).

def ref_forward(u, K, D):
    l_max = u.shape[1]
    lag = jnp.arange(l_max)[:, None] - jnp.arange(l_max)[None, :]        # (L, L)
    toep = jnp.where(lag >= 0, K[:, jnp.clip(lag, 0, l_max - 1)], 0.0)   # (D, L, L)
    y = jnp.einsum("dts,bsd->btd", toep, u.astype(jnp.float32))
    return y.astype(u.dtype) + D * u


# --------------------------------- main --------------------------------------

if __name__ == "__main__":
    d_model, n, l_max, batch = 8, 4, 64, 2

    key = jax.random.PRNGKey(0)
    k_param, k_u = jax.random.split(key)
    B, C, D, step = make_params(k_param, d_model, n)

    u = jax.random.normal(k_u, (batch, l_max, d_model), jnp.float32)
    K = compute_K(B, C, step, n, l_max)            # (D, L)

    # Small tile for the tiny demo (exercises the packed causal-pair axis:
    # n_blk=4 -> 10 pairs).  Real sizes should use the defaults (t_tile=128).
    y = jax.block_until_ready(s4_forward(u, K, D, t_tile=16, d_block=128))
    y_ref = jax.block_until_ready(ref_forward(u, K, D))

    assert y.shape == (batch, l_max, d_model)
    # Per-time-step relative check (K grows geometrically with lag because
    # |diag(Abar)| > 1 for this module's A; a flat atol would be meaningless).
    scale = jnp.maximum(jnp.max(jnp.abs(y_ref), axis=(0, 2), keepdims=True), 1.0)
    err = float(jnp.max(jnp.abs(y - y_ref) / scale))
    assert err < 1e-4, f"mismatch vs reference, max rel err = {err}"

    print("KERNEL_OK")
</pallas_src>

<mosaic_0001>
module attributes {stable_mosaic.version = 11 : i64} {
  func.func @_s4_kernel(%arg0: i32, %arg1: i32, %arg2: i32, %arg3: memref<10xi32, #tpu.memory_space<smem>>, %arg4: memref<10xi32, #tpu.memory_space<smem>>, %arg5: memref<1x16x128xf32, #tpu.memory_space<vmem>>, %arg6: memref<8x80x128xf32, #tpu.memory_space<vmem>>, %arg7: memref<1x128xf32, #tpu.memory_space<vmem>>, %arg8: memref<1x16x128xf32, #tpu.memory_space<vmem>>, %arg9: memref<16x128xf32, #tpu.memory_space<vmem>>) attributes {dimension_semantics = [#tpu.dimension_semantics<parallel>, #tpu.dimension_semantics<parallel>, #tpu.dimension_semantics<arbitrary>], iteration_bounds = array<i64: 2, 1, 10>, scalar_prefetch = 2 : i64, scratch_operands = 1 : i64, tpu.core_type = #tpu.core_type<tc>, window_params = [{transform_indices = @transform_0, window_bounds = array<i64: 1, 16, 128>}, {transform_indices = @transform_1, window_bounds = array<i64: 8, 80, 128>}, {transform_indices = @transform_2, window_bounds = array<i64: 1, 128>}, {transform_indices = @transform_3, window_bounds = array<i64: 1, 16, 128>}]} {
    %0 = arith.index_cast %arg2 : i32 to index
    %1 = memref.load %arg3[%0] : memref<10xi32, #tpu.memory_space<smem>>
    %2 = arith.index_cast %arg2 : i32 to index
    %3 = memref.load %arg4[%2] : memref<10xi32, #tpu.memory_space<smem>>
    %4 = arith.subi %1, %3 : i32
    %c0_i32 = arith.constant 0 : i32
    %5 = arith.cmpi eq, %3, %c0_i32 : i32
    %6 = arith.extui %5 : i1 to i32
    %c0_i32_0 = arith.constant 0 : i32
    %7 = arith.cmpi ne, %6, %c0_i32_0 : i32
    scf.if %7 {
      %cst = arith.constant 0.000000e+00 : f32
      %201 = vector.broadcast %cst : f32 to vector<16x128xf32>
      %c0_93 = arith.constant 0 : index
      %c0_94 = arith.constant 0 : index
      %202 = vector.load %arg9[%c0_93, %c0_94] : memref<16x128xf32, #tpu.memory_space<vmem>>, vector<16x128xf32>
      tpu.vector_store %arg9[%c0_93, %c0_94], %201 {strides = array<i32>} : memref<16x128xf32, #tpu.memory_space<vmem>>, vector<16x128xf32>,
    } else {
    }
    %c0 = arith.constant 0 : index
    %c0_1 = arith.constant 0 : index
    %8 = vector.load %arg9[%c0, %c0_1] : memref<16x128xf32, #tpu.memory_space<vmem>>, vector<16x128xf32>
    %c0_i32_2 = arith.constant 0 : i32
    %c1_i32 = arith.constant 1 : i32
    %9 = arith.addi %4, %c1_i32 : i32
    %c16_i32 = arith.constant 16 : i32
    %10 = arith.muli %9, %c16_i32 : i32
    %c8_i32 = arith.constant 8 : i32
    %11 = arith.muli %c8_i32, %c0_i32_2 : i32
    %12 = arith.subi %10, %11 : i32
    %13 = tpu.assume_multiple %12, 8 : i32
    %c8_i32_3 = arith.constant 8 : i32
    %14 = arith.muli %c8_i32_3, %c0_i32_2 : i32
    %c0_i32_4 = arith.constant 0 : i32
    %15 = arith.addi %14, %c0_i32_4 : i32
    %c0_5 = arith.constant 0 : index
    %16 = arith.index_cast %15 : i32 to index
    %c0_6 = arith.constant 0 : index
    %17 = vector.load %arg5[%c0_5, %16, %c0_6] : memref<1x16x128xf32, #tpu.memory_space<vmem>>, vector<1x1x128xf32>
    %18 = vector.shape_cast %17 : vector<1x1x128xf32> to vector<1x128xf32>
    %c0_7 = arith.constant 0 : index
    %19 = arith.index_cast %13 : i32 to index
    %c0_8 = arith.constant 0 : index
    %20 = vector.load %arg6[%c0_7, %19, %c0_8] : memref<8x80x128xf32, #tpu.memory_space<vmem>>, vector<1x16x128xf32>
    %21 = vector.shape_cast %20 : vector<1x16x128xf32> to vector<16x128xf32>
    %22 = vector.broadcast %18 : vector<1x128xf32> to vector<16x128xf32>
    %23 = arith.mulf %21, %22 : vector<16x128xf32>
    %24 = arith.addf %8, %23 : vector<16x128xf32>
    %c8_i32_9 = arith.constant 8 : i32
    %25 = arith.muli %c8_i32_9, %c0_i32_2 : i32
    %c1_i32_10 = arith.constant 1 : i32
    %26 = arith.addi %25, %c1_i32_10 : i32
    %c0_11 = arith.constant 0 : index
    %27 = arith.index_cast %26 : i32 to index
    %c0_12 = arith.constant 0 : index
    %28 = vector.load %arg5[%c0_11, %27, %c0_12] : memref<1x16x128xf32, #tpu.memory_space<vmem>>, vector<1x1x128xf32>
    %29 = vector.shape_cast %28 : vector<1x1x128xf32> to vector<1x128xf32>
    %c1 = arith.constant 1 : index
    %30 = arith.index_cast %13 : i32 to index
    %c0_13 = arith.constant 0 : index
    %31 = vector.load %arg6[%c1, %30, %c0_13] : memref<8x80x128xf32, #tpu.memory_space<vmem>>, vector<1x16x128xf32>
    %32 = vector.shape_cast %31 : vector<1x16x128xf32> to vector<16x128xf32>
    %33 = vector.broadcast %29 : vector<1x128xf32> to vector<16x128xf32>
    %34 = arith.mulf %32, %33 : vector<16x128xf32>
    %35 = arith.addf %24, %34 : vector<16x128xf32>
    %c8_i32_14 = arith.constant 8 : i32
    %36 = arith.muli %c8_i32_14, %c0_i32_2 : i32
    %c2_i32 = arith.constant 2 : i32
    %37 = arith.addi %36, %c2_i32 : i32
    %c0_15 = arith.constant 0 : index
    %38 = arith.index_cast %37 : i32 to index
    %c0_16 = arith.constant 0 : index
    %39 = vector.load %arg5[%c0_15, %38, %c0_16] : memref<1x16x128xf32, #tpu.memory_space<vmem>>, vector<1x1x128xf32>
    %40 = vector.shape_cast %39 : vector<1x1x128xf32> to vector<1x128xf32>
    %c2 = arith.constant 2 : index
    %41 = arith.index_cast %13 : i32 to index
    %c0_17 = arith.constant 0 : index
    %42 = vector.load %arg6[%c2, %41, %c0_17] : memref<8x80x128xf32, #tpu.memory_space<vmem>>, vector<1x16x128xf32>
    %43 = vector.shape_cast %42 : vector<1x16x128xf32> to vector<16x128xf32>
    %44 = vector.broadcast %40 : vector<1x128xf32> to vector<16x128xf32>
    %45 = arith.mulf %43, %44 : vector<16x128xf32>
    %46 = arith.addf %35, %45 : vector<16x128xf32>
    %c8_i32_18 = arith.constant 8 : i32
    %47 = arith.muli %c8_i32_18, %c0_i32_2 : i32
    %c3_i32 = arith.constant 3 : i32
    %48 = arith.addi %47, %c3_i32 : i32
    %c0_19 = arith.constant 0 : index
    %49 = arith.index_cast %48 : i32 to index
    %c0_20 = arith.constant 0 : index
    %50 = vector.load %arg5[%c0_19, %49, %c0_20] : memref<1x16x128xf32, #tpu.memory_space<vmem>>, vector<1x1x128xf32>
    %51 = vector.shape_cast %50 : vector<1x1x128xf32> to vector<1x128xf32>
    %c3 = arith.constant 3 : index
    %52 = arith.index_cast %13 : i32 to index
    %c0_21 = arith.constant 0 : index
    %53 = vector.load %arg6[%c3, %52, %c0_21] : memref<8x80x128xf32, #tpu.memory_space<vmem>>, vector<1x16x128xf32>
    %54 = vector.shape_cast %53 : vector<1x16x128xf32> to vector<16x128xf32>
    %55 = vector.broadcast %51 : vector<1x128xf32> to vector<16x128xf32>
    %56 = arith.mulf %54, %55 : vector<16x128xf32>
    %57 = arith.addf %46, %56 : vector<16x128xf32>
    %c8_i32_22 = arith.constant 8 : i32
    %58 = arith.muli %c8_i32_22, %c0_i32_2 : i32
    %c4_i32 = arith.constant 4 : i32
    %59 = arith.addi %58, %c4_i32 : i32
    %c0_23 = arith.constant 0 : index
    %60 = arith.index_cast %59 : i32 to index
    %c0_24 = arith.constant 0 : index
    %61 = vector.load %arg5[%c0_23, %60, %c0_24] : memref<1x16x128xf32, #tpu.memory_space<vmem>>, vector<1x1x128xf32>
    %62 = vector.shape_cast %61 : vector<1x1x128xf32> to vector<1x128xf32>
    %c4 = arith.constant 4 : index
    %63 = arith.index_cast %13 : i32 to index
    %c0_25 = arith.constant 0 : index
    %64 = vector.load %arg6[%c4, %63, %c0_25] : memref<8x80x128xf32, #tpu.memory_space<vmem>>, vector<1x16x128xf32>
    %65 = vector.shape_cast %64 : vector<1x16x128xf32> to vector<16x128xf32>
    %66 = vector.broadcast %62 : vector<1x128xf32> to vector<16x128xf32>
    %67 = arith.mulf %65, %66 : vector<16x128xf32>
    %68 = arith.addf %57, %67 : vector<16x128xf32>
    %c8_i32_26 = arith.constant 8 : i32
    %69 = arith.muli %c8_i32_26, %c0_i32_2 : i32
    %c5_i32 = arith.constant 5 : i32
    %70 = arith.addi %69, %c5_i32 : i32
    %c0_27 = arith.constant 0 : index
    %71 = arith.index_cast %70 : i32 to index
    %c0_28 = arith.constant 0 : index
    %72 = vector.load %arg5[%c0_27, %71, %c0_28] : memref<1x16x128xf32, #tpu.memory_space<vmem>>, vector<1x1x128xf32>
    %73 = vector.shape_cast %72 : vector<1x1x128xf32> to vector<1x128xf32>
    %c5 = arith.constant 5 : index
    %74 = arith.index_cast %13 : i32 to index
    %c0_29 = arith.constant 0 : index
    %75 = vector.load %arg6[%c5, %74, %c0_29] : memref<8x80x128xf32, #tpu.memory_space<vmem>>, vector<1x16x128xf32>
    %76 = vector.shape_cast %75 : vector<1x16x128xf32> to vector<16x128xf32>
    %77 = vector.broadcast %73 : vector<1x128xf32> to vector<16x128xf32>
    %78 = arith.mulf %76, %77 : vector<16x128xf32>
    %79 = arith.addf %68, %78 : vector<16x128xf32>
    %c8_i32_30 = arith.constant 8 : i32
    %80 = arith.muli %c8_i32_30, %c0_i32_2 : i32
    %c6_i32 = arith.constant 6 : i32
    %81 = arith.addi %80, %c6_i32 : i32
    %c0_31 = arith.constant 0 : index
    %82 = arith.index_cast %81 : i32 to index
    %c0_32 = arith.constant 0 : index
    %83 = vector.load %arg5[%c0_31, %82, %c0_32] : memref<1x16x128xf32, #tpu.memory_space<vmem>>, vector<1x1x128xf32>
    %84 = vector.shape_cast %83 : vector<1x1x128xf32> to vector<1x128xf32>
    %c6 = arith.constant 6 : index
    %85 = arith.index_cast %13 : i32 to index
    %c0_33 = arith.constant 0 : index
    %86 = vector.load %arg6[%c6, %85, %c0_33] : memref<8x80x128xf32, #tpu.memory_space<vmem>>, vector<1x16x128xf32>
    %87 = vector.shape_cast %86 : vector<1x16x128xf32> to vector<16x128xf32>
    %88 = vector.broadcast %84 : vector<1x128xf32> to vector<16x128xf32>
    %89 = arith.mulf %87, %88 : vector<16x128xf32>
    %90 = arith.addf %79, %89 : vector<16x128xf32>
    %c8_i32_34 = arith.constant 8 : i32
    %91 = arith.muli %c8_i32_34, %c0_i32_2 : i32
    %c7_i32 = arith.constant 7 : i32
    %92 = arith.addi %91, %c7_i32 : i32
    %c0_35 = arith.constant 0 : index
    %93 = arith.index_cast %92 : i32 to index
    %c0_36 = arith.constant 0 : index
    %94 = vector.load %arg5[%c0_35, %93, %c0_36] : memref<1x16x128xf32, #tpu.memory_space<vmem>>, vector<1x1x128xf32>
    %95 = vector.shape_cast %94 : vector<1x1x128xf32> to vector<1x128xf32>
    %c7 = arith.constant 7 : index
    %96 = arith.index_cast %13 : i32 to index
    %c0_37 = arith.constant 0 : index
    %97 = vector.load %arg6[%c7, %96, %c0_37] : memref<8x80x128xf32, #tpu.memory_space<vmem>>, vector<1x16x128xf32>
    %98 = vector.shape_cast %97 : vector<1x16x128xf32> to vector<16x128xf32>
    %99 = vector.broadcast %95 : vector<1x128xf32> to vector<16x128xf32>
    %100 = arith.mulf %98, %99 : vector<16x128xf32>
    %101 = arith.addf %90, %100 : vector<16x128xf32>
    %c1_i32_38 = arith.constant 1 : i32
    %c1_i32_39 = arith.constant 1 : i32
    %102 = arith.addi %4, %c1_i32_39 : i32
    %c16_i32_40 = arith.constant 16 : i32
    %103 = arith.muli %102, %c16_i32_40 : i32
    %c8_i32_41 = arith.constant 8 : i32
    %104 = arith.muli %c8_i32_41, %c1_i32_38 : i32
    %105 = arith.subi %103, %104 : i32
    %106 = tpu.assume_multiple %105, 8 : i32
    %c8_i32_42 = arith.constant 8 : i32
    %107 = arith.muli %c8_i32_42, %c1_i32_38 : i32
    %c0_i32_43 = arith.constant 0 : i32
    %108 = arith.addi %107, %c0_i32_43 : i32
    %c0_44 = arith.constant 0 : index
    %109 = arith.index_cast %108 : i32 to index
    %c0_45 = arith.constant 0 : index
    %110 = vector.load %arg5[%c0_44, %109, %c0_45] : memref<1x16x128xf32, #tpu.memory_space<vmem>>, vector<1x1x128xf32>
    %111 = vector.shape_cast %110 : vector<1x1x128xf32> to vector<1x128xf32>
    %c0_46 = arith.constant 0 : index
    %112 = arith.index_cast %106 : i32 to index
    %c0_47 = arith.constant 0 : index
    %113 = vector.load %arg6[%c0_46, %112, %c0_47] : memref<8x80x128xf32, #tpu.memory_space<vmem>>, vector<1x16x128xf32>
    %114 = vector.shape_cast %113 : vector<1x16x128xf32> to vector<16x128xf32>
    %115 = vector.broadcast %111 : vector<1x128xf32> to vector<16x128xf32>
    %116 = arith.mulf %114, %115 : vector<16x128xf32>
    %117 = arith.addf %101, %116 : vector<16x128xf32>
    %c8_i32_48 = arith.constant 8 : i32
    %118 = arith.muli %c8_i32_48, %c1_i32_38 : i32
    %c1_i32_49 = arith.constant 1 : i32
    %119 = arith.addi %118, %c1_i32_49 : i32
    %c0_50 = arith.constant 0 : index
    %120 = arith.index_cast %119 : i32 to index
    %c0_51 = arith.constant 0 : index
    %121 = vector.load %arg5[%c0_50, %120, %c0_51] : memref<1x16x128xf32, #tpu.memory_space<vmem>>, vector<1x1x128xf32>
    %122 = vector.shape_cast %121 : vector<1x1x128xf32> to vector<1x128xf32>
    %c1_52 = arith.constant 1 : index
    %123 = arith.index_cast %106 : i32 to index
    %c0_53 = arith.constant 0 : index
    %124 = vector.load %arg6[%c1_52, %123, %c0_53] : memref<8x80x128xf32, #tpu.memory_space<vmem>>, vector<1x16x128xf32>
    %125 = vector.shape_cast %124 : vector<1x16x128xf32> to vector<16x128xf32>
    %126 = vector.broadcast %122 : vector<1x128xf32> to vector<16x128xf32>
    %127 = arith.mulf %125, %126 : vector<16x128xf32>
    %128 = arith.addf %117, %127 : vector<16x128xf32>
    %c8_i32_54 = arith.constant 8 : i32
    %129 = arith.muli %c8_i32_54, %c1_i32_38 : i32
    %c2_i32_55 = arith.constant 2 : i32
    %130 = arith.addi %129, %c2_i32_55 : i32
    %c0_56 = arith.constant 0 : index
    %131 = arith.index_cast %130 : i32 to index
    %c0_57 = arith.constant 0 : index
    %132 = vector.load %arg5[%c0_56, %131, %c0_57] : memref<1x16x128xf32, #tpu.memory_space<vmem>>, vector<1x1x128xf32>
    %133 = vector.shape_cast %132 : vector<1x1x128xf32> to vector<1x128xf32>
    %c2_58 = arith.constant 2 : index
    %134 = arith.index_cast %106 : i32 to index
    %c0_59 = arith.constant 0 : index
    %135 = vector.load %arg6[%c2_58, %134, %c0_59] : memref<8x80x128xf32, #tpu.memory_space<vmem>>, vector<1x16x128xf32>
    %136 = vector.shape_cast %135 : vector<1x16x128xf32> to vector<16x128xf32>
    %137 = vector.broadcast %133 : vector<1x128xf32> to vector<16x128xf32>
    %138 = arith.mulf %136, %137 : vector<16x128xf32>
    %139 = arith.addf %128, %138 : vector<16x128xf32>
    %c8_i32_60 = arith.constant 8 : i32
    %140 = arith.muli %c8_i32_60, %c1_i32_38 : i32
    %c3_i32_61 = arith.constant 3 : i32
    %141 = arith.addi %140, %c3_i32_61 : i32
    %c0_62 = arith.constant 0 : index
    %142 = arith.index_cast %141 : i32 to index
    %c0_63 = arith.constant 0 : index
    %143 = vector.load %arg5[%c0_62, %142, %c0_63] : memref<1x16x128xf32, #tpu.memory_space<vmem>>, vector<1x1x128xf32>
    %144 = vector.shape_cast %143 : vector<1x1x128xf32> to vector<1x128xf32>
    %c3_64 = arith.constant 3 : index
    %145 = arith.index_cast %106 : i32 to index
    %c0_65 = arith.constant 0 : index
    %146 = vector.load %arg6[%c3_64, %145, %c0_65] : memref<8x80x128xf32, #tpu.memory_space<vmem>>, vector<1x16x128xf32>
    %147 = vector.shape_cast %146 : vector<1x16x128xf32> to vector<16x128xf32>
    %148 = vector.broadcast %144 : vector<1x128xf32> to vector<16x128xf32>
    %149 = arith.mulf %147, %148 : vector<16x128xf32>
    %150 = arith.addf %139, %149 : vector<16x128xf32>
    %c8_i32_66 = arith.constant 8 : i32
    %151 = arith.muli %c8_i32_66, %c1_i32_38 : i32
    %c4_i32_67 = arith.constant 4 : i32
    %152 = arith.addi %151, %c4_i32_67 : i32
    %c0_68 = arith.constant 0 : index
    %153 = arith.index_cast %152 : i32 to index
    %c0_69 = arith.constant 0 : index
    %154 = vector.load %arg5[%c0_68, %153, %c0_69] : memref<1x16x128xf32, #tpu.memory_space<vmem>>, vector<1x1x128xf32>
    %155 = vector.shape_cast %154 : vector<1x1x128xf32> to vector<1x128xf32>
    %c4_70 = arith.constant 4 : index
    %156 = arith.index_cast %106 : i32 to index
    %c0_71 = arith.constant 0 : index
    %157 = vector.load %arg6[%c4_70, %156, %c0_71] : memref<8x80x128xf32, #tpu.memory_space<vmem>>, vector<1x16x128xf32>
    %158 = vector.shape_cast %157 : vector<1x16x128xf32> to vector<16x128xf32>
    %159 = vector.broadcast %155 : vector<1x128xf32> to vector<16x128xf32>
    %160 = arith.mulf %158, %159 : vector<16x128xf32>
    %161 = arith.addf %150, %160 : vector<16x128xf32>
    %c8_i32_72 = arith.constant 8 : i32
    %162 = arith.muli %c8_i32_72, %c1_i32_38 : i32
    %c5_i32_73 = arith.constant 5 : i32
    %163 = arith.addi %162, %c5_i32_73 : i32
    %c0_74 = arith.constant 0 : index
    %164 = arith.index_cast %163 : i32 to index
    %c0_75 = arith.constant 0 : index
    %165 = vector.load %arg5[%c0_74, %164, %c0_75] : memref<1x16x128xf32, #tpu.memory_space<vmem>>, vector<1x1x128xf32>
    %166 = vector.shape_cast %165 : vector<1x1x128xf32> to vector<1x128xf32>
    %c5_76 = arith.constant 5 : index
    %167 = arith.index_cast %106 : i32 to index
    %c0_77 = arith.constant 0 : index
    %168 = vector.load %arg6[%c5_76, %167, %c0_77] : memref<8x80x128xf32, #tpu.memory_space<vmem>>, vector<1x16x128xf32>
    %169 = vector.shape_cast %168 : vector<1x16x128xf32> to vector<16x128xf32>
    %170 = vector.broadcast %166 : vector<1x128xf32> to vector<16x128xf32>
    %171 = arith.mulf %169, %170 : vector<16x128xf32>
    %172 = arith.addf %161, %171 : vector<16x128xf32>
    %c8_i32_78 = arith.constant 8 : i32
    %173 = arith.muli %c8_i32_78, %c1_i32_38 : i32
    %c6_i32_79 = arith.constant 6 : i32
    %174 = arith.addi %173, %c6_i32_79 : i32
    %c0_80 = arith.constant 0 : index
    %175 = arith.index_cast %174 : i32 to index
    %c0_81 = arith.constant 0 : index
    %176 = vector.load %arg5[%c0_80, %175, %c0_81] : memref<1x16x128xf32, #tpu.memory_space<vmem>>, vector<1x1x128xf32>
    %177 = vector.shape_cast %176 : vector<1x1x128xf32> to vector<1x128xf32>
    %c6_82 = arith.constant 6 : index
    %178 = arith.index_cast %106 : i32 to index
    %c0_83 = arith.constant 0 : index
    %179 = vector.load %arg6[%c6_82, %178, %c0_83] : memref<8x80x128xf32, #tpu.memory_space<vmem>>, vector<1x16x128xf32>
    %180 = vector.shape_cast %179 : vector<1x16x128xf32> to vector<16x128xf32>
    %181 = vector.broadcast %177 : vector<1x128xf32> to vector<16x128xf32>
    %182 = arith.mulf %180, %181 : vector<16x128xf32>
    %183 = arith.addf %172, %182 : vector<16x128xf32>
    %c8_i32_84 = arith.constant 8 : i32
    %184 = arith.muli %c8_i32_84, %c1_i32_38 : i32
    %c7_i32_85 = arith.constant 7 : i32
    %185 = arith.addi %184, %c7_i32_85 : i32
    %c0_86 = arith.constant 0 : index
    %186 = arith.index_cast %185 : i32 to index
    %c0_87 = arith.constant 0 : index
    %187 = vector.load %arg5[%c0_86, %186, %c0_87] : memref<1x16x128xf32, #tpu.memory_space<vmem>>, vector<1x1x128xf32>
    %188 = vector.shape_cast %187 : vector<1x1x128xf32> to vector<1x128xf32>
    %c7_88 = arith.constant 7 : index
    %189 = arith.index_cast %106 : i32 to index
    %c0_89 = arith.constant 0 : index
    %190 = vector.load %arg6[%c7_88, %189, %c0_89] : memref<8x80x128xf32, #tpu.memory_space<vmem>>, vector<1x16x128xf32>
    %191 = vector.shape_cast %190 : vector<1x16x128xf32> to vector<16x128xf32>
    %192 = vector.broadcast %188 : vector<1x128xf32> to vector<16x128xf32>
    %193 = arith.mulf %191, %192 : vector<16x128xf32>
    %194 = arith.addf %183, %193 : vector<16x128xf32>
    %c2_i32_90 = arith.constant 2 : i32
    %195 = arith.cmpi ne, %3, %1 : i32
    %196 = arith.extui %195 : i1 to i32
    %c0_i32_91 = arith.constant 0 : i32
    %197 = arith.cmpi ne, %196, %c0_i32_91 : i32
    scf.if %197 {
      %c0_93 = arith.constant 0 : index
      %c0_94 = arith.constant 0 : index
      %201 = vector.load %arg9[%c0_93, %c0_94] : memref<16x128xf32, #tpu.memory_space<vmem>>, vector<16x128xf32>
      tpu.vector_store %arg9[%c0_93, %c0_94], %194 {strides = array<i32>} : memref<16x128xf32, #tpu.memory_space<vmem>>, vector<16x128xf32>,
    } else {
    }
    %198 = arith.cmpi eq, %3, %1 : i32
    %199 = arith.extui %198 : i1 to i32
    %c0_i32_92 = arith.constant 0 : i32
    %200 = arith.cmpi ne, %199, %c0_i32_92 : i32
    scf.if %200 {
      %c0_93 = arith.constant 0 : index
      %c0_94 = arith.constant 0 : index
      %201 = vector.load %arg7[%c0_93, %c0_94] : memref<1x128xf32, #tpu.memory_space<vmem>>, vector<1x128xf32>
      %c0_95 = arith.constant 0 : index
      %c0_96 = arith.constant 0 : index
      %c0_97 = arith.constant 0 : index
      %202 = vector.load %arg5[%c0_95, %c0_96, %c0_97] : memref<1x16x128xf32, #tpu.memory_space<vmem>>, vector<1x16x128xf32>
      %203 = vector.shape_cast %202 : vector<1x16x128xf32> to vector<16x128xf32>
      %204 = vector.broadcast %201 : vector<1x128xf32> to vector<16x128xf32>
      %205 = arith.mulf %204, %203 : vector<16x128xf32>
      %206 = arith.addf %194, %205 : vector<16x128xf32>
      %c0_98 = arith.constant 0 : index
      %c0_99 = arith.constant 0 : index
      %c0_100 = arith.constant 0 : index
      %207 = vector.load %arg8[%c0_98, %c0_99, %c0_100] : memref<1x16x128xf32, #tpu.memory_space<vmem>>, vector<1x16x128xf32>
      %208 = vector.shape_cast %207 : vector<1x16x128xf32> to vector<16x128xf32>
      %209 = vector.shape_cast %206 : vector<16x128xf32> to vector<1x16x128xf32>
      tpu.vector_store %arg8[%c0_98, %c0_99, %c0_100], %209 {strides = array<i32>} : memref<1x16x128xf32, #tpu.memory_space<vmem>>, vector<1x16x128xf32>,
    } else {
    }
    return
  }
  func.func @transform_0(%arg0: i32, %arg1: i32, %arg2: i32, %arg3: memref<10xi32, #tpu.memory_space<smem>>, %arg4: memref<10xi32, #tpu.memory_space<smem>>) -> (i32, i32, i32) {
    %0 = arith.index_cast %arg2 : i32 to index
    %1 = memref.load %arg4[%0] : memref<10xi32, #tpu.memory_space<smem>>
    %c0_i32 = arith.constant 0 : i32
    return %arg0, %1, %arg1 : i32, i32, i32
  }
  func.func @transform_1(%arg0: i32, %arg1: i32, %arg2: i32, %arg3: memref<10xi32, #tpu.memory_space<smem>>, %arg4: memref<10xi32, #tpu.memory_space<smem>>) -> (i32, i32, i32) {
    %c0_i32 = arith.constant 0 : i32
    %c0_i32_0 = arith.constant 0 : i32
    %c0_i32_1 = arith.constant 0 : i32
    return %c0_i32, %c0_i32_0, %arg1 : i32, i32, i32
  }
  func.func @transform_2(%arg0: i32, %arg1: i32, %arg2: i32, %arg3: memref<10xi32, #tpu.memory_space<smem>>, %arg4: memref<10xi32, #tpu.memory_space<smem>>) -> (i32, i32) {
    %c0_i32 = arith.constant 0 : i32
    %c0_i32_0 = arith.constant 0 : i32
    return %c0_i32, %arg1 : i32, i32
  }
  func.func @transform_3(%arg0: i32, %arg1: i32, %arg2: i32, %arg3: memref<10xi32, #tpu.memory_space<smem>>, %arg4: memref<10xi32, #tpu.memory_space<smem>>) -> (i32, i32, i32) {
    %0 = arith.index_cast %arg2 : i32 to index
    %1 = memref.load %arg3[%0] : memref<10xi32, #tpu.memory_space<smem>>
    %c0_i32 = arith.constant 0 : i32
    return %arg0, %1, %arg1 : i32, i32, i32
  }
}

</mosaic_0001>

<bundles_post_ra>
// kernel: tpu_custom_call.1
= control target key start
LH: loop header
LB: loop body
LE: loop exit
PB: predicated region body
PF: predicated region fallthrough
CT: control target
= control target key end

     0   :  { %s1568_s0 = inlined_call_operand.hbm [shape: s32[10], index: 0, kind: input, shape index: {}]   ;;  %s1569_s2 = inlined_call_operand.hbm [shape: f32[2,64,128], index: 2, kind: input, shape index: {}]   ;;  %s1570_s3 = inlined_call_operand.hbm [shape: f32[8,80,128], index: 3, kind: input, shape index: {}]   ;;  %s1571_s4 = inlined_call_operand.vmem [shape: f32[1,128], index: 4, kind: input, shape index: {}]   ;;  %s1572_s5 = inlined_call_operand.hbm [shape: f32[2,64,128], index: 5, kind: output, shape index: {}]   ;;  %s1573_s1 = inlined_call_operand.vmem [shape: s32[10], index: 1, kind: input, shape index: {}]  }
   0x1   :  { %1587 = sst [smem:[#allocation25_spill]] %s1570_s3  ;;  %s951_s20 = scalar_lea.hbm %s1568_s0, 16 }
   0x2   :  { %1588 = sst [smem:[#allocation26_spill]] %s1572_s5  ;;  %p952_p0 = scmp.ne.s32.totalorder %s1568_s0, %s951_s20 }
   0x3   :  { %p955_p1 = scmp.lt.u32.totalorder %s951_s20, %s1568_s0 }
   0x5   :  { %p957_p2 = pnand %p955_p1, %p952_p0 }
   0x7   :  { %960 = shalt.err (!%p957_p2)  }
   0x8   :  { %s1161_s25 = smov [#allocation4]   ;;  %s12_s30 = sshll.u32 %s1573_s1, 4  ;;  %s13_s30 = int_to_ptr.vmem [resolvable:$true] %s12_s30 }
   0x9   :  { %11 = dma.hbm_to_smem %s1568_s0, 16, %s1161_s25, [#allocation3] }
   0xa   :  { %s961_s6 = scalar_lea.vmem %s13_s30, 16  ;;  %p966_p4 = scmp.lt.s32.totalorder %s13_s30, %s13_s30 }
   0xb   :  { %p962_p3 = scmp.ne.s32.totalorder %s13_s30, %s961_s6  ;;  %p967_p5 = scmp.lt.s32.totalorder %s961_s6, %s961_s6 }
   0xd   :  { %p968_p6 = por %p967_p5, %p966_p4 }
   0xf   :  { %p969_p7 = pnand %p968_p6, %p962_p3 }
  0x11   :  { %972 = shalt.err (!%p969_p7)  }
  0x12   :  { %s1162_s7 = smov [#allocation5]  }
  0x13   :  { %15 = dma.vmem_to_smem %s13_s30, 16, %s1162_s7, [#allocation3] }
  0x14   :  { %1103 = dma.done.wait [#allocation3], 32 }
  0x15   :  { %1104 = vsyncadd [#allocation3], 4294967264 }
  0x16   :  { %17 = sfence }
  0x17   :  { %18 = vsyncpa [#allocation7], 0 }
  0x18   :  { %20 = vsyncpa [#allocation7 + $0x1], 0 }
  0x19   :  { %21 = vsyncpa [#allocation10], 0 }
  0x1a   :  { %22 = vsyncpa [#allocation8], 0 }
  0x1b   :  { %24 = vsyncpa [#allocation8 + $0x1], 0  ;;  %s1216_s0 = smov 0   ;;  %s1218_s1 = smov 0  }
  0x1c   :  { %s1220_s8 = smov 0   ;;  %s1222_s9 = smov 0  }
  0x1d   :  { %s1224_s10 = smov 0   ;;  %s1226_s11 = smov 0  }
  0x1e   :  { %s1228_s12 = smov 0   ;;  %s1230_s13 = smov 0  }
  0x1f   :  { %s1232_s14 = smov 0   ;;  %s1234_s15 = smov 0  }
  0x20   :  { %s1236_s16 = smov 0  }
  0x21 LB: > { %1589 = sst [smem:[#allocation19_spill]] %s1119_s0  ;;  %s695_s17 = sadd.s32 4294967295, %s1159_s16   ;;  %s1159_s16 = sphi %s1236_s16, %s30_s16   ;;  %s1155_s15 = sphi %s1234_s15, %s1625_s15   ;;  %s1151_s14 = sphi %s1232_s14, %s1616_s14   ;;  %s1147_s13 = sphi %s1230_s13, %s1624_s13   ;;  %s1143_s12 = sphi %s1228_s12, %s1615_s12   ;;  %s1139_s11 = sphi %s1226_s11, %s1623_s11   ;;  %s1135_s10 = sphi %s1224_s10, %s1622_s10   ;;  %s1131_s9 = sphi %s1222_s9, %s1621_s9   ;;  %s1127_s8 = sphi %s1220_s8, %s1620_s8   ;;  %s1123_s1 = sphi %s1218_s1, %s1619_s1   ;;  %s1119_s0 = sphi %s1216_s0, %s1618_s0  }
  0x22   : > { %1590 = sst [smem:[#allocation20_spill]] %s1151_s14  ;;  %s696_s18 = sadd.s32 4294967294, %s1159_s16  }
  0x23   : > { %p75_p8 = scmp.ne.s32.totalorder %s1135_s10, %s1131_s9  ;;  %p1272_p9 = scmp.eq.s32.totalorder %s695_s17, 0 }
  0x24   : > { %p156_p10 = scmp.ne.s32.totalorder %s1127_s8, %s1123_s1  ;;  %p157_p12 = scmp.eq.s32.totalorder %s695_s17, 19 }
  0x25   : > { %s1591_s19 = scalar_select %p1272_p9, 1, 0 }
  0x26   : > { %p1280_p11 = por %p1272_p9, %p75_p8  ;;  %p162_p13 = scmp.ne.s32.totalorder %s1123_s1, %s1119_s0 }
  0x27   : > { %p163_p0 = scmp.eq.s32.totalorder %s696_s18, 19  ;;  %p1286_p1 = por %p157_p12, %p156_p10 }
  0x28   : > { %s1592_s20 = scalar_select %p1280_p11, 1, 0 }
  0x29   : > { %s1593_s21 = scalar_select %p1286_p1, 1, 0 }
  0x2a   : > { %p697_p2 = scmp.ge.s32.totalorder %s1159_s16, 1  ;;  %p1291_p3 = por %p163_p0, %p162_p13 }
  0x2b   : > { %p170_p4 = scmp.lt.s32.totalorder %s1159_s16, 21  ;;  %s1163_s24 = smov [#allocation9]  }
  0x2c   : > { %s1594_s22 = scalar_select %p1291_p3, 1, 0 }
  0x2d   : > { %p1296_p5 = pnand %p697_p2, %p170_p4  ;;  %s184_s25 = sshll.u32 %s1163_s24, 4  ;;  %s185_s25 = int_to_ptr.vmem [resolvable:$true] %s184_s25 }
  0x2e   : > { %1595 = sst [smem:[#allocation21_spill]] %s1594_s22  ;;  %s1598_s3 = sld [smem:[#allocation25_spill]] }
  0x2f   : > { %s1596_s23 = scalar_select %p1296_p5, 1, 0 }
  0x30   : > { %p837_p6 = pneg %p1296_p5 }
  0x32   : > { %p1304_p7 = pnand %p837_p6, %p1272_p9 }
  0x34   : > { %s973_s29 = scalar_lea.hbm %s1598_s3, 10240  ;;  %p975_p10 = pneg %p1304_p7 }
  0x35   : > { %p974_p8 = scmp.ne.s32.totalorder %s1598_s3, %s973_s29  ;;  %p980_p0 = scmp.lt.u32.totalorder %s973_s29, %s1598_s3 }
  0x37   : > { %p976_p12 = pnand %p975_p10, %p974_p8 }
  0x39   : > { %p977_p13 = pneg %p976_p12 }
  0x3b   : > { %p982_p2 = pnand %p980_p0, %p977_p13 }
  0x3d   : > { %985 = shalt.err (!%p982_p2)
}
  0x3e   : > { %s986_s17 = scalar_lea.vmem %s185_s25, 10240  ;;  %p994_p1 = scmp.lt.s32.totalorder %s185_s25, %s185_s25 }
  0x3f   : > { %p987_p4 = scmp.ne.s32.totalorder %s185_s25, %s986_s17  ;;  %p995_p9 = scmp.lt.s32.totalorder %s986_s17, %s986_s17 }
  0x41   : > { %p989_p6 = pnand %p987_p4, %p975_p10  ;;  %p996_p11 = por %p995_p9, %p994_p1 }
  0x43   : > { %p990_p3 = pneg %p989_p6 }
  0x45   : > { %p997_p5 = pnand %p996_p11, %p990_p3 }
  0x47   : > { %1000 = shalt.err (!%p997_p5)
}
  0x48   : > { %s1579_s18 = smov 128   ;;  %s1580_s24 = smov 8  }
  0x49   : > { %840 = dma.hbm_to_vmem [thread:$0]  (!%p1304_p7), %s1598_s3, 10240, %s185_s25, [#allocation10], %s1579_s18, %s1579_s18, %s1580_s24  }
  0x4a   : > { %s42_s29 = sadd.s32 1, %s1151_s14  ;;  %s49_s30 = sadd.s32 1, %s1155_s15 }
  0x4b   : > { %p43_p9 = scmp.ge.s32.totalorder %s42_s29, 10  ;;  %s53_s6 = sld [smem:[#allocation5 + %s1151_s14]] }
  0x4c   : > { %p69_p11 = scmp.ne.s32.totalorder %s1139_s11, %s1135_s10  ;;  %p70_p3 = scmp.eq.s32.totalorder %s1159_s16, 0 }
  0x4d   : > { %s1627_s29 = smov (%p43_p9, %s42_s29), 0  ;;  %s1629_s30 = smov (!%p43_p9, %s49_s30), %s1155_s15 }
  0x4e   : > { %1599 = sst [smem:[#allocation22_spill]] %s1627_s29  ;;  %p51_p1 = scmp.ge.s32.totalorder %s1629_s30, 2 }
  0x4f   : > { %s54_s26 = sld [smem:[#allocation5 + %s1627_s29]]  ;;  %s146_s25 = sadd.s32 1, %s1127_s8 }
  0x50   : > { %s137_s7 = sld [smem:[#allocation4 + %s1151_s14]]  ;;  %s1631_s30 = smov (%p51_p1, %s1629_s30), 0 }
  0x51   : > { %s138_s9 = sld [smem:[#allocation4 + %s1627_s29]]  ;;  %s55_s17 = ssub.s32 %s1155_s15, %s1631_s30 }
  0x52   : > { %1600 = sst [smem:[#allocation23_spill]] %s1631_s30  ;;  %s62_s27 = sadd.s32 1, %s1139_s11 }
  0x53   : > { %p1345_p5 = por %p70_p3, %p69_p11  ;;  %s204_s3 = sand.u32 1, %s1139_s11  }
  0x54   : > { %p852_p8 = scmp.lt.s32.totalorder %s1159_s16, 20  ;;  %s701_s30 = sshll.u32 %s204_s3, 4 }
  0x55   : > { %s56_s28 = ssub.s32 %s53_s6, %s54_s26  ;;  %s1376_s18 = scalar_lea.sflag [#allocation7], %s204_s3 }
  0x56   : > { %s57_s24 = sor.u32 %s56_s28, %s55_s17  ;;  %p1364_p12 = pnand %p852_p8, %p1345_p5 }
  0x57   : > { %p60_p7 = scmp.eq.s32.totalorder %s57_s24, 0  ;;  %s140_s29 = ssub.s32 %s137_s7, %s138_s9 }
  0x58   : > { %s141_s22 = sor.u32 %s140_s29, %s55_s17  ;;  %s703_s29 = sshll.u32 %s1155_s15, 3 }
  0x59   : > { %s1352_s0 = scalar_select %p60_p7, %s1139_s11, %s62_s27  }
  0x5a   : > { %p144_p10 = scmp.eq.s32.totalorder %s141_s22, 0  ;;  %s208_s7 = scalar_lea.vmem [#allocation6], %s701_s30 }
  0x5b   : > { %1602 = sst [smem:[#allocation24_spill]] %s1352_s0  ;;  %s219_s22 = sshll.u32 %s208_s7, 4  ;;  %s1369_s22 = int_to_ptr.vmem [resolvable:$true] %s219_s22 }
  0x5c   : > { %s827_s6 = scalar_select %p1345_p5, [#allocation5], [#allocation12] }
  0x5d   : > { %s1357_s26 = scalar_select %p144_p10, %s1127_s8, %s146_s25  }
  0x5e   : > { %s828_s5 = scalar_select %p1345_p5, %s1151_s14, 0 }
  0x5f   : > { %s1633_s6 = smov (!%p852_p8, %s827_s6), [#allocation14]  ;;  %p1003_p0 = pneg %p1364_p12 }
  0x60   : > { %s1635_s5 = smov (!%p852_p8, %s828_s5), 0  ;;  %s1006_s14 = scalar_lea.hbm %s1569_s2, 2048 }
  0x61   : > { %s209_s24 = sld [smem:[%s1633_s6 + %s1635_s5]] }
  0x67   : > { %s702_s9 = sshll.u32 %s209_s24, 1 }
  0x68   : > { %s216_s17 = sadd.s32 %s703_s29, %s702_s9 }
  0x69   : > { %s704_s25 = sshll.u32 %s216_s17, 7 }
  0x6a   : > { %s1374_s0 = scalar_lea.hbm %s1569_s2, %s704_s25 }
  0x6b   : > { %s1001_s5 = scalar_lea.hbm %s1374_s0, 256  ;;  %p1007_p6 = scmp.lt.u32.totalorder %s1374_s0, %s1569_s2 }
  0x6c   : > { %p1002_p13 = scmp.ne.s32.totalorder %s1374_s0, %s1001_s5  ;;  %p1008_p9 = scmp.lt.u32.totalorder %s1006_s14, %s1001_s5 }
  0x6d   : > { %p1010_p1 = scmp.lt.u32.totalorder %s1001_s5, %s1374_s0 }
  0x6e   : > { %p1004_p2 = pnand %p1003_p0, %p1002_p13  ;;  %p1009_p11 = por %p1008_p9, %p1007_p6 }
  0x70   : > { %p1005_p4 = pneg %p1004_p2  ;;  %p1011_p3 = por %p1010_p1, %p1009_p11 }
  0x72   : > { %p1012_p5 = pnand %p1011_p3, %p1005_p4 }
  0x74   : > { %1015 = shalt.err (!%p1012_p5)
}
  0x75   : > { %s1016_s3 = scalar_lea.vmem %s1369_s22, 256  ;;  %s1166_s7 = smov [#allocation6]  }
  0x76   : > { %p1017_p7 = scmp.ne.s32.totalorder %s1369_s22, %s1016_s3  ;;  %s1021_s9 = sshll.u32 %s1166_s7, 4  ;;  %s1022_s9 = int_to_ptr.vmem [resolvable:$false] %s1021_s9 }
  0x77   : > { %s1023_s17 = scalar_lea.vmem %s1022_s9, 512  ;;  %p1024_p13 = scmp.lt.s32.totalorder %s1369_s22, %s1022_s9 }
  0x78   : > { %p1019_p8 = pnand %p1017_p7, %p1003_p0  ;;  %p1025_p2 = scmp.lt.s32.totalorder %s1023_s17, %s1016_s3 }
  0x7a   : > { %p1020_p10 = pneg %p1019_p8  ;;  %p1026_p6 = por %p1025_p2, %p1024_p13 }
  0x7c   : > { %p1027_p9 = pnand %p1026_p6, %p1020_p10 }
  0x7e   : > { %1030 = shalt.err (!%p1027_p9)
}
  0x7f   : > { %s1604_s25 = smov 8   ;;  %s1605_s27 = smov 128  }
  0x80   : > { %846 = dma.hbm_to_vmem [thread:$0]  (!%p1364_p12), %s1374_s0, 256, %s1369_s22, %s1376_s18, %s1605_s27, %s1605_s27, %s1604_s25  }
  0x81   : > { %p1606_p0 = scmp.ne.s32.totalorder %s1596_s23, 0 }
  0x82   : > { %s233_s5 = sand.u32 (!%p1606_p0), 1, %s1135_s10   ;;  %p1607_p4 = scmp.ne.s32.totalorder (!%p1606_p0), %s1592_s20, 0 }
  0x83   : > { %231 = sbr.rel (%p1606_p0) target bundleno = 234 (0xea), region = 32  ;;  %s706_s30 = sshll.u32 (!%p1606_p0), %s233_s5, 4 }
  0x84   : > { %s234_s6 = scalar_lea.sflag (!%p1606_p0), [#allocation7], %s233_s5  ;;  %s1410_s14 = scalar_lea.vmem (!%p1606_p0), [#allocation6], %s706_s30 }
  0x8a   : > { %1106 = dma.done.wait (%p1607_p4), %s234_s6, 256  }
  0x8b   : > { %1108 = vsyncadd (%p1607_p4), %s234_s6, 4294967040  ;;  %p1608_p11 = scmp.ne.s32.totalorder %s1591_s19, 0 }
  0x8d   : > { %1110 = dma.done.wait (%p1608_p11), [#allocation10], 10240  }
  0x8e   : > { %1112 = vsyncadd (%p1608_p11), [#allocation10], 4294957056  ;;  %s264_s0 = sand.u32 1, %s1123_s1   ;;  %s1422_s23 = sld [smem:[#allocation4 + %s1143_s12]] }
  0x8f   : > { %s1425_s28 = sld [smem:[#allocation5 + %s1143_s12]]  ;;  %s708_s20 = sshll.u32 %s264_s0, 4 }
  0x90   : > { %s1431_s18 = scalar_lea.vmem [#allocation11], %s708_s20 }
  0x95   : > { %s276_s22 = ssub.s32 %s1422_s23, %s1425_s28  ;;  %p709_p12 = scmp.ne.s32.totalorder %s1425_s28, 0 }
  0x96   : > { %v1167_v0 = vmov (!%p709_p12), 0.0  }
  0x97   : > { %280 = sbr.rel (%p709_p12) target bundleno = 158 (0x9e), region = 44  ;;  %281 = vst [vmem:[#allocation2] sm:$0xff] (!%p709_p12), %v1167_v0  ;;  %282 = vst [vmem:[#allocation2 + $0x8] sm:$0xff] (!%p709_p12), %v1167_v0 }
  0x9e PF: > { %v283_v1 = vld [vmem:[#allocation2] sm:$0xff]  ;;  %s783_s19 = sshll.u32 %s276_s22, 4  ;;  %v284_v3 = vld [vmem:[#allocation2 + $0x8] sm:$0xff]  ;;  %p774_p1 = scmp.eq.s32.totalorder %s1425_s28, %s1422_s23 }
  0x9f   : > { %v714_v2 = vld [vmem:[%s1410_s14] ss:$0 sm:$0xff]  ;;  %v718_v4 = vld [vmem:[%s1410_s14 + $0x1] ss:$0 sm:$0xff]  ;;  %v722_v5 = vld [vmem:[%s1410_s14 + $0x2] ss:$0 sm:$0xff] }
  0xa0   : > { %s1437_s24 = scalar_lea.vmem [#allocation9], %s783_s19  ;;  %v726_v16 = vld [vmem:[%s1410_s14 + $0x3] ss:$0 sm:$0xff]  ;;  %v730_v23 = vld [vmem:[%s1410_s14 + $0x4] ss:$0 sm:$0xff] }
  0xa1   : > { %v712_v6 = vld [vmem:[%s1437_s24 + $0x10] sm:$0xff]  ;;  %v713_v7 = vld [vmem:[%s1437_s24 + $0x18] sm:$0xff]  ;;  %v716_v8 = vld [vmem:[%s1437_s24 + $0x60] sm:$0xff] }
  0xa2   : > { %v295_v9 = vmul.f32 %v714_v2, %v712_v6  ;;  %v296_v10 = vmul.f32 %v714_v2, %v713_v7  ;;  %v717_v11 = vld [vmem:[%s1437_s24 + $0x68] sm:$0xff]  ;;  %v308_v12 = vmul.f32 %v718_v4, %v716_v8  ;;  %v720_v13 = vld [vmem:[%s1437_s24 + $0xb0] sm:$0xff]  ;;  %v721_v14 = vld [vmem:[%s1437_s24 + $0xb8] sm:$0xff] }
  0xa3   : > { %v309_v15 = vmul.f32 %v718_v4, %v717_v11  ;;  %v1447_v17 = vld [vmem:[%s1437_s24 + $0x100] sm:$0xff]  ;;  %v725_v18 = vld [vmem:[%s1437_s24 + $0x108] sm:$0xff]  ;;  %v321_v21 = vmul.f32 %v722_v5, %v720_v13  ;;  %v322_v22 = vmul.f32 %v722_v5, %v721_v14  ;;  %v728_v24 = vld [vmem:[%s1437_s24 + $0x150] sm:$0xff] }
  0xa4   : > { %v297_v19 = vadd.f32 %v295_v9, %v283_v1  ;;  %v298_v20 = vadd.f32 %v296_v10, %v284_v3  ;;  %v729_v25 = vld [vmem:[%s1437_s24 + $0x158] sm:$0xff]  ;;  %v334_v28 = vmul.f32 %v726_v16, %v1447_v17  ;;  %v335_v29 = vmul.f32 %v726_v16, %v725_v18  ;;  %v734_v30 = vld [vmem:[%s1410_s14 + $0x5] ss:$0 sm:$0xff]  ;;  %v733_v32 = vld [vmem:[%s1437_s24 + $0x1a8] sm:$0xff] }
  0xa5   : > { %v732_v31 = vld [vmem:[%s1437_s24 + $0x1a0] sm:$0xff]  ;;  %v347_v35 = vmul.f32 %v730_v23, %v728_v24  ;;  %v348_v36 = vmul.f32 %v730_v23, %v729_v25  ;;  %v736_v38 = vld [vmem:[%s1437_s24 + $0x1f0] sm:$0xff]  ;;  %v737_v39 = vld [vmem:[%s1437_s24 + $0x1f8] sm:$0xff]  ;;  %v361_v43 = vmul.f32 %v734_v30, %v733_v32 }
  0xa6   : > { %v310_v26 = vadd.f32 %v308_v12, %v297_v19  ;;  %v311_v27 = vadd.f32 %v309_v15, %v298_v20  ;;  %v738_v37 = vld [vmem:[%s1410_s14 + $0x6] ss:$0 sm:$0xff]  ;;  %v360_v42 = vmul.f32 %v734_v30, %v732_v31  ;;  %v742_v44 = vld [vmem:[%s1410_s14 + $0x7] ss:$0 sm:$0xff]  ;;  %v741_v46 = vld [vmem:[%s1437_s24 + $0x248] sm:$0xff] }
  0xa7   : > { %v740_v45 = vld [vmem:[%s1437_s24 + $0x240] sm:$0xff]  ;;  %v373_v49 = vmul.f32 %v738_v37, %v736_v38  ;;  %v374_v50 = vmul.f32 %v738_v37, %v737_v39  ;;  %v745_v51 = vld [vmem:[%s1410_s14 + $0x8] ss:$0 sm:$0xff]  ;;  %v387_v56 = vmul.f32 %v742_v44, %v741_v46  ;;  %v749_v57 = vld [vmem:[%s1410_s14 + $0x9] ss:$0 sm:$0xff] }
  0xa8   : > { %v323_v33 = vadd.f32 %v321_v21, %v310_v26  ;;  %v324_v34 = vadd.f32 %v322_v22, %v311_v27  ;;  %v795_v52 = vld [vmem:[%s1437_s24 + $0x8] sm:$0xff]  ;;  %v386_v55 = vmul.f32 %v742_v44, %v740_v45  ;;  %v799_v58 = vld [vmem:[%s1437_s24 + $0x58] sm:$0xff]  ;;  %v400_v62 = vmul.f32 %v745_v51, %v712_v6 }
  0xa9   : > { %v399_v61 = vmul.f32 %v795_v52, %v745_v51  ;;  %v753_v63 = vld [vmem:[%s1410_s14 + $0xa] ss:$0 sm:$0xff]  ;;  %v412_v3 = vmul.f32 %v799_v58, %v749_v57  ;;  %v413_v4 = vmul.f32 %v749_v57, %v716_v8  ;;  %v757_v5 = vld [vmem:[%s1410_s14 + $0xb] ss:$0 sm:$0xff]  ;;  %v761_v14 = vld [vmem:[%s1410_s14 + $0xc] ss:$0 sm:$0xff] }
  0xaa   : > { %v336_v40 = vadd.f32 %v334_v28, %v323_v33  ;;  %v337_v41 = vadd.f32 %v335_v29, %v324_v34  ;;  %v803_v0 = vld [vmem:[%s1437_s24 + $0xa8] sm:$0xff]  ;;  %v807_v7 = vld [vmem:[%s1437_s24 + $0xf8] sm:$0xff]  ;;  %v426_v12 = vmul.f32 %v753_v63, %v720_v13  ;;  %v439_v19 = vmul.f32 %v757_v5, %v1447_v17 }
  0xab   : > { %v425_v11 = vmul.f32 %v803_v0, %v753_v63  ;;  %v811_v15 = vld [vmem:[%s1437_s24 + $0x148] sm:$0xff]  ;;  %v438_v18 = vmul.f32 %v807_v7, %v757_v5  ;;  %v815_v21 = vld [vmem:[%s1437_s24 + $0x198] sm:$0xff]  ;;  %v452_v25 = vmul.f32 %v761_v14, %v728_v24 }
  0xac   : > { %v349_v47 = vadd.f32 %v347_v35, %v336_v40  ;;  %v350_v48 = vadd.f32 %v348_v36, %v337_v41  ;;  %v765_v20 = vld [vmem:[%s1410_s14 + $0xd] ss:$0 sm:$0xff]  ;;  %v451_v23 = vmul.f32 %v811_v15, %v761_v14  ;;  %v769_v26 = vld [vmem:[%s1410_s14 + $0xe] ss:$0 sm:$0xff]  ;;  %v773_v32 = vld [vmem:[%s1410_s14 + $0xf] ss:$0 sm:$0xff] }
  0xad   : > { %v819_v27 = vld [vmem:[%s1437_s24 + $0x1e8] sm:$0xff]  ;;  %v464_v13 = vmul.f32 %v815_v21, %v765_v20  ;;  %v465_v30 = vmul.f32 %v765_v20, %v732_v31  ;;  %v823_v33 = vld [vmem:[%s1437_s24 + $0x238] sm:$0xff]  ;;  %v478_v37 = vmul.f32 %v769_v26, %v736_v38  ;;  %v491_v41 = vmul.f32 %v773_v32, %v740_v45 }
  0xae   : > { %v362_v53 = vadd.f32 %v360_v42, %v349_v47  ;;  %v363_v54 = vadd.f32 %v361_v43, %v350_v48  ;;  %v477_v36 = vmul.f32 %v819_v27, %v769_v26  ;;  %v490_v40 = vmul.f32 %v823_v33, %v773_v32 }
  0xb0   : > { %v375_v59 = vadd.f32 %v373_v49, %v362_v53  ;;  %v376_v60 = vadd.f32 %v374_v50, %v363_v54 }
  0xb2   : > { %v388_v1 = vadd.f32 %v386_v55, %v375_v59  ;;  %v389_v2 = vadd.f32 %v387_v56, %v376_v60 }
  0xb4   : > { %v401_v9 = vadd.f32 %v399_v61, %v388_v1  ;;  %v402_v10 = vadd.f32 %v400_v62, %v389_v2 }
  0xb6   : > { %v414_v16 = vadd.f32 %v412_v3, %v401_v9  ;;  %v415_v6 = vadd.f32 %v413_v4, %v402_v10 }
  0xb8   : > { %v427_v8 = vadd.f32 %v425_v11, %v414_v16  ;;  %v428_v22 = vadd.f32 %v426_v12, %v415_v6 }
  0xba   : > { %v440_v28 = vadd.f32 %v438_v18, %v427_v8  ;;  %v441_v29 = vadd.f32 %v439_v19, %v428_v22 }
  0xbc   : > { %v453_v34 = vadd.f32 %v451_v23, %v440_v28  ;;  %v454_v35 = vadd.f32 %v452_v25, %v441_v29  ;;  %497 = sbr.rel (%p774_p1) target bundleno = 197 (0xc5), region = 48 }
  0xbe   : > { %v466_v39 = vadd.f32 %v464_v13, %v453_v34  ;;  %v467_v17 = vadd.f32 %v465_v30, %v454_v35 }
  0xc0   : > { %v479_v42 = vadd.f32 %v477_v36, %v466_v39  ;;  %v480_v43 = vadd.f32 %v478_v37, %v467_v17 }
  0xc2   : > { %v492_v44 = vadd.f32 %v490_v40, %v479_v42  ;;  %v493_v24 = vadd.f32 %v491_v41, %v480_v43 }
  0xc4   : > { %498 = vst [vmem:[#allocation2] sm:$0xff] %v492_v44  ;;  %499 = vst [vmem:[#allocation2 + $0x8] sm:$0xff] %v493_v24 }
  0xc5 PF: > { %p775_p3 = scmp.ne.s32.totalorder %s1425_s28, %s1422_s23 }
  0xc6   : > { %v776_v31 = vld [vmem:[%s1571_s4] ss:$0 sm:$0xff] (!%p775_p3)  ;;  %v506_v45 = vld [vmem:[%s1410_s14 + $0x8] sm:$0xff] (!%p775_p3) }
  0xc7   : > { %503 = sbr.rel (%p775_p3) target bundleno = 206 (0xce), region = 52  ;;  %v505_v38 = vld [vmem:[%s1410_s14] sm:$0xff] (!%p775_p3)  ;;  %v514_v47 = vmul.f32 (!%p775_p3), %v776_v31, %v506_v45 }
  0xc8   : > { %v513_v46 = vmul.f32 (!%p775_p3), %v776_v31, %v505_v38 }
  0xc9   : > { %v516_v49 = vadd.f32 (!%p775_p3), %v514_v47, %v493_v24 }
  0xca   : > { %v515_v48 = vadd.f32 (!%p775_p3), %v513_v46, %v492_v44 }
  0xcb   : > { %518 = vst [vmem:[%s1431_s18 + $0x8] sm:$0xff] (!%p775_p3), %v516_v49 }
  0xcc   : > { %517 = vst [vmem:[%s1431_s18] sm:$0xff] (!%p775_p3), %v515_v48 }
  0xce PF: > { %p1609_p5 = scmp.ne.s32.totalorder %s1593_s21, 0  ;;  %s537_s17 = sshll.u32 %s1431_s18, 4  ;;  %s1498_s17 = int_to_ptr.vmem [resolvable:$true] %s537_s17 }
  0xcf   : > { %s779_s25 = sshll.u32 %s1147_s13, 3  ;;  %s1610_s23 = sld [smem:[#allocation26_spill]] }
  0xd0   : > { %s833_s7 = scalar_select %p1609_p5, [#allocation4], [#allocation13] }
  0xd1   : > { %s1637_s12 = smov (!%p1609_p5, %s1143_s12), 0  ;;  %s1507_s20 = scalar_lea.sflag [#allocation8], %s264_s0 }
  0xd2   : > { %s527_s9 = sld [smem:[%s833_s7 + %s1637_s12]]  ;;  %s1031_s22 = scalar_lea.vmem %s1498_s17, 256 }
  0xd3   : > { %p1032_p7 = scmp.ne.s32.totalorder %s1498_s17, %s1031_s22  ;;  %s1168_s12 = smov [#allocation11]  }
  0xd4   : > { %s1035_s13 = sshll.u32 %s1168_s12, 4  ;;  %s1036_s13 = int_to_ptr.vmem [resolvable:$false] %s1035_s13 }
  0xd5   : > { %p1033_p8 = pnand %p1032_p7, %p1609_p5  ;;  %s1037_s18 = scalar_lea.vmem %s1036_s13, 512 }
  0xd6   : > { %p1038_p13 = scmp.lt.s32.totalorder %s1498_s17, %s1036_s13  ;;  %p1039_p2 = scmp.lt.s32.totalorder %s1037_s18, %s1031_s22 }
  0xd7   : > { %p1034_p10 = pneg %p1033_p8 }
  0xd8   : > { %s778_s27 = sshll.u32 %s527_s9, 1  ;;  %p1040_p6 = por %p1039_p2, %p1038_p13 }
  0xd9   : > { %s534_s5 = sadd.s32 %s779_s25, %s778_s27 }
  0xda   : > { %s780_s30 = sshll.u32 %s534_s5, 7  ;;  %p1041_p9 = pnand %p1040_p6, %p1034_p10 }
  0xdb   : > { %s1503_s28 = scalar_lea.hbm %s1610_s23, %s780_s30 }
  0xdc   : > { %1044 = shalt.err (!%p1041_p9)
}
  0xdd   : > { %s1045_s0 = scalar_lea.hbm %s1503_s28, 256  ;;  %s1049_s29 = scalar_lea.hbm %s1610_s23, 2048 }
  0xde   : > { %p1046_p0 = scmp.ne.s32.totalorder %s1503_s28, %s1045_s0  ;;  %p1050_p12 = scmp.lt.u32.totalorder %s1503_s28, %s1610_s23 }
  0xdf   : > { %p1051_p1 = scmp.lt.u32.totalorder %s1049_s29, %s1045_s0  ;;  %p1053_p7 = scmp.lt.u32.totalorder %s1045_s0, %s1503_s28 }
  0xe0   : > { %p1047_p4 = pnand %p1046_p0, %p1609_p5 }
  0xe1   : > { %p1052_p3 = por %p1051_p1, %p1050_p12 }
  0xe2   : > { %p1048_p11 = pneg %p1047_p4 }
  0xe3   : > { %p1054_p8 = por %p1053_p7, %p1052_p3 }
  0xe5   : > { %p1055_p10 = pnand %p1054_p8, %p1048_p11 }
  0xe7   : > { %1058 = shalt.err (!%p1055_p10)
}
  0xe8   : > { %s1169_s9 = smov 128   ;;  %s1170_s25 = smov 8  }
  0xe9   : > { %835 = dma.vmem_to_hbm [thread:$0]  (%p1609_p5), %s1498_s17, 256, %s1503_s28, %s1507_s20, %s1169_s9, %s1169_s9, %s1170_s25  }
  0xea PF: > { %s1611_s27 = sld [smem:[#allocation19_spill]]  ;;  %s1612_s5 = sld [smem:[#allocation21_spill]] }
  0xeb   : > { %p854_p13 = scmp.ge.s32.totalorder %s1159_s16, 2 }
  0xf0   : > { %s552_s30 = sand.u32 1, %s1611_s27   ;;  %p1613_p2 = scmp.ne.s32.totalorder %s1612_s5, 0 }
  0xf1   : > { %s553_s6 = scalar_lea.sflag [#allocation8], %s552_s30 }
  0xf2   : > { %p848_p6 = pnand %p854_p13, %p1613_p2 }
  0xf4   : > { %1114 = dma.done.wait (!%p848_p6), %s553_s6, 256  }
  0xf5   : > { %1116 = vsyncadd (!%p848_p6), %s553_s6, 4294967040  ;;  %s30_s16 = sadd.s32 1, %s1159_s16   ;;  %s1614_s21 = sld [smem:[#allocation24_spill]] }
  0xf6   : > { %p27_p9 = scmp.ge.s32.totalorder %s30_s16, 22   ;;  %s1615_s12 = sld [smem:[#allocation20_spill]] }
  0xf7   : > { %s1616_s14 = sld [smem:[#allocation22_spill]]  ;;  %s1617_s17 = sld [smem:[#allocation23_spill]] }
  0xf8   : > { %s1618_s0 = smov %s1123_s1  ;;  %s1619_s1 = smov %s1127_s8 }
  0xf9   : > { %s1620_s8 = smov %s1357_s26  ;;  %s1621_s9 = smov %s1135_s10 }
  0xfa   : > { %s1622_s10 = smov %s1139_s11  ;;  %s1624_s13 = smov %s1155_s15 }
  0xfb   : > { %s1623_s11 = smov %s1614_s21  ;;  %29 = sbr.rel (!%p27_p9) target bundleno = 33 (0x21), region = 113 }
  0xfd   : > { %s1625_s15 = smov %s1617_s17 }
 0x102   :  { %558 = vsyncpa [#allocation7], 1 }
 0x103   :  { %560 = vsyncpa [#allocation7 + $0x1], 1 }
 0x104   :  { %561 = vsyncpa [#allocation10], 1 }
 0x105   :  { %562 = vsyncpa [#allocation8], 1 }
 0x106   :  { %564 = vsyncpa [#allocation8 + $0x1], 1 }

</bundles_post_ra>
